<compile_context>
chip_gen: v7x
topology: tpu7x:2x2x1
jax: 0.10.0
libtpu: 0.0.40
codegen_flags: <defaults>
</compile_context>

<pallas_src>
import functools

import jax
import jax.numpy as jnp
from jax.experimental import pallas as pl
from jax.experimental.pallas import tpu as pltpu


def _bce_tile(p, t):
    """Elementwise sanitized BCE (PyTorch BCELoss semantics) in float32."""
    p = p.astype(jnp.float32)
    # NaN and +/-Inf -> 0 with a single fused compare+select.  Note: relying on
    # clamp alone would map +Inf to 1, but the reference maps +Inf to 0, so the
    # isfinite() select must stay.
    p = jnp.where(jnp.isfinite(p), p, 0.0)
    p = jnp.clip(p, 0.0, 1.0)
    t = t.astype(jnp.float32)
    # PyTorch BCELoss clamps the log terms at -100 to avoid inf loss.
    log_p = jnp.maximum(jnp.log(p), -100.0)
    log_1mp = jnp.maximum(jnp.log(1.0 - p), -100.0)
    # Factored form -(log_1mp + t*(log_p - log_1mp)) saves one multiply/elem.
    return -(log_1mp + t * (log_p - log_1mp))


# -------- single-block path (no grid): realistic PANNs configuration --------
def _panns_loss_single_kernel(p_ref, t_ref, out_ref, *, total_count):
    bce = _bce_tile(p_ref[...], t_ref[...])
    out_ref[0, 0] = jnp.sum(bce) / jnp.float32(total_count)


# -------- tiled path: big row tiles, per-TensorCore partial sums --------
def _panns_loss_tiled_kernel(p_ref, t_ref, out_ref, *,
                             batch, row_tile, tiles_per_split,
                             num_row_tiles, ragged, has_dup):
    i = pl.program_id(1)                        # reduction axis of this split
    g = pl.program_id(0) * tiles_per_split + i  # global row-tile index

    @pl.when(i == 0)
    def _():
        out_ref[...] = jnp.zeros_like(out_ref)

    def accumulate(mask_rows):
        bce = _bce_tile(p_ref[...], t_ref[...])
        if mask_rows:
            # Rows past the true batch come from a partially out-of-bounds
            # block (unspecified data).  Keep this a SELECT (not a
            # multiplicative mask) so stray NaN/Inf from garbage rows cannot
            # leak into the sum; the mean divisor stays exactly B*C.
            row = (jax.lax.broadcasted_iota(jnp.int32, bce.shape, 0)
                   + g * row_tile)
            bce = jnp.where(row < batch, bce, 0.0)
        # Fold row_tile rows onto 8 sublanes with pure VPU adds (layout no-op
        # reshape); the cross-lane reduction is deferred to a single jnp.sum
        # outside the kernel.  Also keeps per-lane partial sums (better
        # conditioned than one running f32 scalar).
        r, c = bce.shape
        out_ref[...] += jnp.sum(bce.reshape(r // 8, 8, c), axis=0)

    if ragged:
        @pl.when(g == num_row_tiles - 1)   # last real (partial) tile: masked
        def _():
            accumulate(True)

        @pl.when(g < num_row_tiles - 1)    # interior tiles: no masking cost
        def _():
            accumulate(False)
    elif has_dup:
        @pl.when(g < num_row_tiles)        # skip duplicated clamp-tiles
        def _():
            accumulate(False)
    else:
        accumulate(False)


def _tpu_hardware():
    """Returns (vmem_capacity_bytes, tensorcores_per_device) with fallbacks."""
    vmem_cap = None
    try:
        info = pltpu.get_tpu_info()
        vmem_cap = int(getattr(info, "vmem_capacity_bytes", 0)) or None
    except Exception:
        vmem_cap = None
    kind = ""
    try:
        kind = jax.devices()[0].device_kind.lower()
    except Exception:
        kind = ""
    if "lite" in kind or "v5e" in kind or "v6e" in kind:
        n_cores = 1                       # single-TensorCore inference chips
    elif any(v in kind for v in ("v4", "v5p", "v7")):
        n_cores = 2                       # megacore (v4/v5p) and v7x: 2 TCs
    else:
        n_cores = 1
    if vmem_cap is None:
        vmem_cap = 64 * 1024 * 1024 if "v7" in kind else 128 * 1024 * 1024
    return vmem_cap, n_cores


def panns_loss(clipwise_output, target, *,
               vmem_budget_bytes=None,
               single_block_max_bytes=None,
               vmem_limit_bytes=None,
               num_splits=None):
    """Pallas implementation of PANNsLoss.forward (scalar mean BCE loss).

    clipwise_output / target may be any float (or integer/bool, for target)
    dtype; narrow dtypes (bf16 predictions, int8 multi-hot targets) halve HBM
    traffic and are upcast to f32 inside the kernel.
    """
    B, C = clipwise_output.shape
    assert target.shape == (B, C)
    total_count = B * C

    vmem_cap, n_cores = _tpu_hardware()
    if vmem_limit_bytes is None:
        # v7x has only 64 MiB VMEM per TC -> cap the scoped limit at 48 MiB;
        # v5e/v6e have 128 MiB physical, so 64 MiB is safe and lets tiles grow.
        vmem_limit_bytes = (48 * 1024 * 1024 if vmem_cap <= 64 * 1024 * 1024
                            else 64 * 1024 * 1024)
    if vmem_budget_bytes is None:
        # Budget covers both double-buffered input streams; leave half the
        # limit as headroom for the output block and compiler scratch.
        vmem_budget_bytes = vmem_limit_bytes // 2
    if single_block_max_bytes is None:
        # Multi-TensorCore chips benefit from the parallel tiled path earlier;
        # single-core chips keep the no-grid latency path longer.
        single_block_max_bytes = (512 * 1024 if n_cores >= 2
                                  else 2 * 1024 * 1024)

    lanes = pl.cdiv(C, 128) * 128          # lane-padded width moved per row
    p_bytes = jnp.dtype(clipwise_output.dtype).itemsize
    t_bytes = jnp.dtype(target.dtype).itemsize
    per_row_bytes = lanes * (p_bytes + t_bytes)
    rows_padded = pl.cdiv(B, 32) * 32

    # ---- small problem: single block, no grid, no pipeline ----
    if rows_padded * per_row_bytes <= single_block_max_bytes:
        out = pl.pallas_call(
            functools.partial(_panns_loss_single_kernel,
                              total_count=total_count),
            out_shape=jax.ShapeDtypeStruct((1, 1), jnp.float32),
            in_specs=[pl.BlockSpec(memory_space=pltpu.MemorySpace.VMEM),
                      pl.BlockSpec(memory_space=pltpu.MemorySpace.VMEM)],
            out_specs=pl.BlockSpec(memory_space=pltpu.MemorySpace.SMEM),
            compiler_params=pltpu.CompilerParams(
                vmem_limit_bytes=vmem_limit_bytes),
        )(clipwise_output, target)
        return out[0, 0]

    # ---- large problem: pipelined row tiles + per-TensorCore partial sums ----
    # Biggest row tile such that (2 input streams x 2 pipeline buffers) stays
    # inside the budget; a multiple of 32 rows keeps f32/bf16/int8 sublane
    # tiling legal.
    row_tile = max(32, (vmem_budget_bytes // (2 * per_row_bytes)) // 32 * 32)
    row_tile = min(row_tile, rows_padded)

    num_row_tiles = pl.cdiv(B, row_tile)
    if num_splits is None:
        num_splits = n_cores
    num_splits = max(1, min(num_splits, num_row_tiles))
    tiles_per_split = pl.cdiv(num_row_tiles, num_splits)

    ragged = (B % row_tile) != 0
    has_dup = (num_splits * tiles_per_split) != num_row_tiles

    kernel = functools.partial(
        _panns_loss_tiled_kernel,
        batch=B, row_tile=row_tile,
        tiles_per_split=tiles_per_split,
        num_row_tiles=num_row_tiles,
        ragged=ragged, has_dup=has_dup)

    # Duplicated tail tiles (when tile count doesn't divide evenly among
    # splits) are clamped back in range so the DMA stays in bounds; their
    # compute and accumulation are skipped inside the kernel with pl.when.
    def in_map(s, i):
        return (jnp.minimum(s * tiles_per_split + i, num_row_tiles - 1), 0)

    out = pl.pallas_call(
        kernel,
        out_shape=jax.ShapeDtypeStruct((num_splits * 8, C), jnp.float32),
        grid_spec=pltpu.PrefetchScalarGridSpec(
            num_scalar_prefetch=0,
            grid=(num_splits, tiles_per_split),
            in_specs=[
                pl.BlockSpec((row_tile, C), in_map),
                pl.BlockSpec((row_tile, C), in_map),
            ],
            out_specs=pl.BlockSpec((8, C), lambda s, i: (s, 0)),
        ),
        compiler_params=pltpu.CompilerParams(
            dimension_semantics=("parallel", "arbitrary"),
            vmem_limit_bytes=vmem_limit_bytes,
        ),
    )(clipwise_output, target)

    # Per-split, per-lane partial sums; single cross-lane reduce outside the
    # kernel, then the mean divisor.
    return jnp.sum(out) / jnp.float32(total_count)


def panns_loss_ref(clipwise_output, target):
    """Pure-JAX reference matching PyTorch BCELoss semantics."""
    p = clipwise_output.astype(jnp.float32)
    p = jnp.where(jnp.isnan(p), 0.0, p)
    p = jnp.where(jnp.isinf(p), 0.0, p)
    p = jnp.clip(p, 0.0, 1.0)
    t = target.astype(jnp.float32)
    log_p = jnp.maximum(jnp.log(p), -100.0)
    log_1mp = jnp.maximum(jnp.log(1.0 - p), -100.0)
    return jnp.mean(-(t * log_p + (1.0 - t) * log_1mp))


if __name__ == "__main__":
    key = jax.random.PRNGKey(0)
    k1, k2, k3, k4, k5, k6 = jax.random.split(key, 6)

    # ---- Case 1: realistic (small) PANNs shape -> single-block fast path ----
    B1, C1 = 8, 527  # AudioSet: 527 classes
    p1 = jax.random.uniform(k1, (B1, C1), jnp.float32, 1e-3, 1.0 - 1e-3)
    p1 = p1.at[0, 0].set(jnp.nan)
    p1 = p1.at[1, 5].set(jnp.inf)
    p1 = p1.at[2, 7].set(-jnp.inf)
    p1 = p1.at[3, 11].set(1.7)    # clamped to 1
    p1 = p1.at[4, 13].set(-0.3)   # clamped to 0
    t1 = (jax.random.uniform(k2, (B1, C1)) < 0.1).astype(jnp.float32)

    inputs1 = {"clipwise_output": p1}
    loss1 = jax.block_until_ready(panns_loss(inputs1["clipwise_output"], t1))
    ref1 = panns_loss_ref(inputs1["clipwise_output"], t1)
    assert jnp.allclose(loss1, ref1, rtol=1e-5, atol=1e-5), (loss1, ref1)

    # ---- Case 2: tiled/pipelined path (ragged batch, bf16 targets) ----
    B2, C2 = 100, 527
    p2 = jax.random.uniform(k3, (B2, C2), jnp.float32, 1e-3, 1.0 - 1e-3)
    p2 = p2.at[0, 0].set(jnp.nan)
    p2 = p2.at[17, 100].set(jnp.inf)
    p2 = p2.at[63, 3].set(-2.0)
    t2 = (jax.random.uniform(k4, (B2, C2)) < 0.1).astype(jnp.bfloat16)

    loss2 = jax.block_until_ready(
        panns_loss(p2, t2,
                   vmem_budget_bytes=256 * 1024,   # tiny budget -> multi-tile grid
                   single_block_max_bytes=0))      # force the tiled path
    ref2 = panns_loss_ref(p2, t2)
    assert jnp.allclose(loss2, ref2, rtol=1e-5, atol=1e-5), (loss2, ref2)

    # ---- Case 3: narrow dtypes (bf16 preds, int8 targets), 2-way split with
    #      a duplicated clamp-tile and a ragged last tile ----
    B3, C3 = 80, 527
    p3 = jax.random.uniform(k5, (B3, C3), jnp.float32, 1e-3, 1.0 - 1e-3)
    p3 = p3.astype(jnp.bfloat16)
    p3 = p3.at[7, 2].set(jnp.nan)
    p3 = p3.at[40, 1].set(jnp.inf)
    t3 = (jax.random.uniform(k6, (B3, C3)) < 0.1).astype(jnp.int8)

    loss3 = jax.block_until_ready(
        panns_loss(p3, t3,
                   vmem_budget_bytes=128 * 1024,   # row_tile=32 -> 3 row tiles
                   single_block_max_bytes=0,
                   num_splits=2))                  # exercises dup-tile skip
    ref3 = panns_loss_ref(p3, t3)
    assert jnp.allclose(loss3, ref3, rtol=1e-5, atol=1e-5), (loss3, ref3)

    print("KERNEL_OK")
</pallas_src>

<mosaic_0001>
module attributes {stable_mosaic.version = 11 : i64} {
  func.func @_panns_loss_single_kernel(%arg0: memref<8x527xf32, #tpu.memory_space<vmem>>, %arg1: memref<8x527xf32, #tpu.memory_space<vmem>>, %arg2: memref<1x1xf32, #tpu.memory_space<smem>>) attributes {dimension_semantics = [], scalar_prefetch = 0 : i64, scratch_operands = 0 : i64, tpu.core_type = #tpu.core_type<tc>} {
    %c0 = arith.constant 0 : index
    %c0_0 = arith.constant 0 : index
    %0 = vector.load %arg0[%c0, %c0_0] : memref<8x527xf32, #tpu.memory_space<vmem>>, vector<8x527xf32>
    %c0_1 = arith.constant 0 : index
    %c0_2 = arith.constant 0 : index
    %1 = vector.load %arg1[%c0_1, %c0_2] : memref<8x527xf32, #tpu.memory_space<vmem>>, vector<8x527xf32>
    %2 = tpu.weird %0 : vector<8x527xf32> -> vector<8x527xi1>
    %cst = arith.constant dense<true> : vector<8x527xi1>
    %3 = arith.xori %2, %cst : vector<8x527xi1>
    %cst_3 = arith.constant 0.000000e+00 : f32
    %4 = vector.broadcast %cst_3 : f32 to vector<8x527xf32>
    %5 = arith.select %3, %0, %4 : vector<8x527xi1>, vector<8x527xf32>
    %cst_4 = arith.constant 0.000000e+00 : f32
    %cst_5 = arith.constant 1.000000e+00 : f32
    %6 = vector.broadcast %cst_4 : f32 to vector<8x527xf32>
    %7 = arith.maximumf %6, %5 : vector<8x527xf32>
    %8 = vector.broadcast %cst_5 : f32 to vector<8x527xf32>
    %9 = arith.minimumf %8, %7 : vector<8x527xf32>
    %10 = math.log %9 : vector<8x527xf32>
    %cst_6 = arith.constant -1.000000e+02 : f32
    %11 = vector.broadcast %cst_6 : f32 to vector<8x527xf32>
    %12 = arith.maximumf %10, %11 : vector<8x527xf32>
    %cst_7 = arith.constant 1.000000e+00 : f32
    %13 = vector.broadcast %cst_7 : f32 to vector<8x527xf32>
    %14 = arith.subf %13, %9 : vector<8x527xf32>
    %15 = math.log %14 : vector<8x527xf32>
    %cst_8 = arith.constant -1.000000e+02 : f32
    %16 = vector.broadcast %cst_8 : f32 to vector<8x527xf32>
    %17 = arith.maximumf %15, %16 : vector<8x527xf32>
    %18 = arith.subf %12, %17 : vector<8x527xf32>
    %19 = arith.mulf %1, %18 : vector<8x527xf32>
    %20 = arith.addf %17, %19 : vector<8x527xf32>
    %cst_9 = arith.constant 0.000000e+00 : f32
    %21 = vector.broadcast %cst_9 : f32 to vector<8x527xf32>
    %22 = arith.subf %21, %20 : vector<8x527xf32>
    %23 = vector.shape_cast %22 : vector<8x527xf32> to vector<1x8x527xf32>
    %cst_10 = arith.constant dense<0.000000e+00> : vector<1xf32>
    %24 = vector.multi_reduction <add>, %23, %cst_10 [1, 2] : vector<1x8x527xf32> to vector<1xf32>
    %25 = vector.shape_cast %24 : vector<1xf32> to vector<1x1x1xf32>
    %26 = vector.extract %25[0, 0, 0] : f32 from vector<1x1x1xf32>
    %cst_11 = arith.constant 4.216000e+03 : f32
    %27 = arith.divf %26, %cst_11 : f32
    %c0_12 = arith.constant 0 : index
    %c0_13 = arith.constant 0 : index
    %28 = memref.load %arg2[%c0_12, %c0_13] : memref<1x1xf32, #tpu.memory_space<smem>>
    memref.store %27, %arg2[%c0_12, %c0_13] : memref<1x1xf32, #tpu.memory_space<smem>>
    return
  }
}

</mosaic_0001>

<bundles_post_ra>
// kernel: tpu_custom_call.1
= control target key start
LH: loop header
LB: loop body
LE: loop exit
PB: predicated region body
PF: predicated region fallthrough
CT: control target
= control target key end

     0   :  { %7 = vsyncpa [#allocation3], 0  ;;  %s302_s0 = inlined_call_operand.hbm [shape: f32[8,527], index: 0, kind: input, shape index: {}]   ;;  %s303_s1 = inlined_call_operand.hbm [shape: f32[8,527], index: 1, kind: input, shape index: {}]   ;;  %s304_s2 = inlined_call_operand.hbm [shape: f32[1,1], index: 2, kind: output, shape index: {}]  }
   0x1   :  { %8 = vsyncpa [#allocation6], 0 }
   0x2   :  { %9 = vsyncpa [#allocation4], 0  ;;  %s247_s9 = smov [#allocation2]   ;;  %s248_s11 = smov [#allocation5]  }
   0x3   :  { %s16_s10 = sshll.u32 %s247_s9, 4  ;;  %s26_s12 = sshll.u32 %s248_s11, 4  ;;  %s17_s10 = int_to_ptr.vmem [resolvable:$true] %s16_s10  ;;  %s27_s12 = int_to_ptr.vmem [resolvable:$true] %s26_s12 }
   0x4   :  { %s187_s15 = scalar_lea.hbm %s302_s0, 640 }
   0x5   :  { %p188_p0 = scmp.ne.s32.totalorder %s302_s0, %s187_s15  ;;  %p191_p1 = scmp.lt.u32.totalorder %s187_s15, %s302_s0 }
   0x7   :  { %p193_p2 = pnand %p191_p1, %p188_p0 }
   0x9   :  { %196 = shalt.err (!%p193_p2)
}
   0xa   :  { %s197_s20 = scalar_lea.vmem %s17_s10, 640  ;;  %p202_p4 = scmp.lt.s32.totalorder %s17_s10, %s17_s10 }
   0xb   :  { %p198_p3 = scmp.ne.s32.totalorder %s17_s10, %s197_s20  ;;  %p203_p5 = scmp.lt.s32.totalorder %s197_s20, %s197_s20 }
   0xd   :  { %p204_p6 = por %p203_p5, %p202_p4 }
   0xf   :  { %p205_p7 = pnand %p204_p6, %p198_p3 }
  0x11   :  { %208 = shalt.err (!%p205_p7)
}
  0x12   :  { %19 = dma.hbm_to_vmem [thread:$0]  %s302_s0, 640, %s17_s10, [#allocation3]  }
  0x13   :  { %s209_s25 = scalar_lea.hbm %s303_s1, 640 }
  0x14   :  { %p210_p8 = scmp.ne.s32.totalorder %s303_s1, %s209_s25  ;;  %p213_p9 = scmp.lt.u32.totalorder %s209_s25, %s303_s1 }
  0x16   :  { %p215_p10 = pnand %p213_p9, %p210_p8 }
  0x18   :  { %218 = shalt.err (!%p215_p10)
}
  0x19   :  { %s219_s30 = scalar_lea.vmem %s27_s12, 640  ;;  %p224_p12 = scmp.lt.s32.totalorder %s27_s12, %s27_s12 }
  0x1a   :  { %p220_p11 = scmp.ne.s32.totalorder %s27_s12, %s219_s30  ;;  %p225_p13 = scmp.lt.s32.totalorder %s219_s30, %s219_s30 }
  0x1c   :  { %p226_p0 = por %p225_p13, %p224_p12 }
  0x1e   :  { %p227_p1 = pnand %p226_p0, %p220_p11 }
  0x20   :  { %230 = shalt.err (!%p227_p1)
}
  0x21   :  { %29 = dma.hbm_to_vmem [thread:$0]  %s303_s1, 640, %s27_s12, [#allocation6]  }
  0x22   :  { %241 = dma.done.wait [#allocation3], 640  }
  0x23   :  { %242 = vsyncadd [#allocation3], 4294966656 }
  0x24   :  { %243 = dma.done.wait [#allocation6], 640  }
  0x25   :  { %244 = vsyncadd [#allocation6], 4294966656  ;;  %v36_v0 = vld [vmem:[#allocation2] sm:$0xff]  ;;  %v37_v1 = vld [vmem:[#allocation2 + $0x8] sm:$0xff]  ;;  %vm249_vm4 = vmmov 1   ;;  %vm129_vm11 = vcmask 121856  }
  0x26   :  { %v38_v2 = vld [vmem:[#allocation2 + $0x10] sm:$0xff]  ;;  %v39_v3 = vld [vmem:[#allocation2 + $0x18] sm:$0xff]  ;;  %v40_v4 = vld [vmem:[#allocation2 + $0x20] sm:$0xff]  ;;  %vm46_vm0 = vweird.f32 %v36_v0  ;;  %vm47_vm1 = vweird.f32 %v37_v1  ;;  %s231_s7 = scalar_lea.hbm %s304_s2, 16 }
  0x27   :  { %vm48_vm2 = vweird.f32 %v38_v2  ;;  %vm49_vm3 = vweird.f32 %v39_v3  ;;  %vm51_vm5 = vmxor %vm46_vm0, %vm249_vm4  ;;  %vm50_vm6 = vweird.f32 %v40_v4  ;;  %v41_v47 = vld [vmem:[#allocation5] sm:$0xff]  ;;  %v42_v51 = vld [vmem:[#allocation5 + $0x8] sm:$0xff]  ;;  %p232_p2 = scmp.ne.s32.totalorder %s304_s2, %s231_s7  ;;  %p235_p3 = scmp.lt.u32.totalorder %s231_s7, %s304_s2 }
  0x28   :  { %vm52_vm7 = vmxor %vm47_vm1, %vm249_vm4  ;;  %v56_v5 = vsel %vm51_vm5, %v36_v0, 0.0  ;;  %v43_v56 = vld [vmem:[#allocation5 + $0x10] sm:$0xff]  ;;  %v44_v59 = vld [vmem:[#allocation5 + $0x18] sm:$0xff] }
  0x29   :  { %vm53_vm8 = vmxor %vm48_vm2, %vm249_vm4  ;;  %v57_v6 = vsel %vm52_vm7, %v37_v1, 0.0  ;;  %v61_v7 = vmax.f32 %v56_v5, 0.0  ;;  %v45_v63 = vld [vmem:[#allocation5 + $0x20] sm:$0xff]  ;;  %p237_p4 = pnand %p235_p3, %p232_p2 }
  0x2a   :  { %vm54_vm9 = vmxor %vm49_vm3, %vm249_vm4  ;;  %v58_v8 = vsel %vm53_vm8, %v38_v2, 0.0  ;;  %v62_v9 = vmax.f32 %v57_v6, 0.0 }
  0x2b   :  { %vm55_vm10 = vmxor %vm50_vm6, %vm249_vm4  ;;  %v59_v10 = vsel %vm54_vm9, %v39_v3, 0.0  ;;  %v63_v11 = vmax.f32 %v58_v8, 0.0  ;;  %v66_v12 = vmin.f32 %v61_v7, 1.0 }
  0x2c   :  { %v60_v13 = vsel %vm55_vm10, %v40_v4, 0.0  ;;  %v64_v14 = vmax.f32 %v59_v10, 0.0  ;;  %v67_v15 = vmin.f32 %v62_v9, 1.0 }
  0x2d   :  { %v65_v16 = vmax.f32 %v60_v13, 0.0  ;;  %v68_v17 = vmin.f32 %v63_v11, 1.0  ;;  %167 = vlog2.f32 %v66_v12  ;;  %v86_v19 = vsub.f32 1.0, %v66_v12 }
  0x2e   :  { %v69_v18 = vmin.f32 %v64_v14, 1.0  ;;  %169 = vlog2.f32 %v67_v15  ;;  %v87_v21 = vsub.f32 1.0, %v67_v15 }
  0x2f   :  { %v70_v20 = vmin.f32 %v65_v16, 1.0  ;;  %171 = vlog2.f32 %v68_v17  ;;  %v88_v22 = vsub.f32 1.0, %v68_v17 }
  0x30   :  { %173 = vlog2.f32 %v69_v18  ;;  %v89_v23 = vsub.f32 1.0, %v69_v18 }
  0x31   :  { %175 = vlog2.f32 %v70_v20  ;;  %v90_v24 = vsub.f32 1.0, %v70_v20 }
  0x32   :  { %177 = vlog2.f32 %v86_v19 }
  0x33   :  { %179 = vlog2.f32 %v87_v21 }
  0x34   :  { %181 = vlog2.f32 %v88_v22 }
  0x35   :  { %183 = vlog2.f32 %v89_v23 }
  0x36   :  { %185 = vlog2.f32 %v90_v24 }
  0x37   :  { %v168_v25 = vpop.eup %167 }
  0x38   :  { %v170_v26 = vpop.eup %169  ;;  %v72_v28 = vmul.f32 0.6931472, %v168_v25 }
  0x39   :  { %v172_v27 = vpop.eup %171  ;;  %v74_v30 = vmul.f32 0.6931472, %v170_v26 }
  0x3a   :  { %v174_v29 = vpop.eup %173  ;;  %v76_v32 = vmul.f32 0.6931472, %v172_v27  ;;  %v81_v37 = vmax.f32 %v72_v28, -100.0 }
  0x3b   :  { %v176_v31 = vpop.eup %175  ;;  %v78_v34 = vmul.f32 0.6931472, %v174_v29  ;;  %v82_v40 = vmax.f32 %v74_v30, -100.0 }
  0x3c   :  { %v178_v33 = vpop.eup %177  ;;  %v80_v36 = vmul.f32 0.6931472, %v176_v31  ;;  %v83_v43 = vmax.f32 %v76_v32, -100.0 }
  0x3d   :  { %v180_v35 = vpop.eup %179  ;;  %v92_v38 = vmul.f32 0.6931472, %v178_v33  ;;  %v84_v48 = vmax.f32 %v78_v34, -100.0 }
  0x3e   :  { %v182_v39 = vpop.eup %181  ;;  %v94_v41 = vmul.f32 0.6931472, %v180_v35  ;;  %v85_v52 = vmax.f32 %v80_v36, -100.0 }
  0x3f   :  { %v184_v42 = vpop.eup %183  ;;  %v96_v44 = vmul.f32 0.6931472, %v182_v39  ;;  %v101_v45 = vmax.f32 %v92_v38, -100.0 }
  0x40   :  { %v186_v46 = vpop.eup %185  ;;  %v98_v49 = vmul.f32 0.6931472, %v184_v42  ;;  %v102_v50 = vmax.f32 %v94_v41, -100.0 }
  0x41   :  { %v100_v53 = vmul.f32 0.6931472, %v186_v46  ;;  %v103_v54 = vmax.f32 %v96_v44, -100.0  ;;  %v106_v55 = vsub.f32 %v81_v37, %v101_v45 }
  0x42   :  { %v104_v57 = vmax.f32 %v98_v49, -100.0  ;;  %v107_v58 = vsub.f32 %v82_v40, %v102_v50 }
  0x43   :  { %v105_v60 = vmax.f32 %v100_v53, -100.0  ;;  %v108_v61 = vsub.f32 %v83_v43, %v103_v54  ;;  %v111_v62 = vmul.f32 %v106_v55, %v41_v47 }
  0x44   :  { %v109_v0 = vsub.f32 %v84_v48, %v104_v57  ;;  %v112_v1 = vmul.f32 %v107_v58, %v42_v51 }
  0x45   :  { %v110_v2 = vsub.f32 %v85_v52, %v105_v60  ;;  %v113_v3 = vmul.f32 %v108_v61, %v43_v56  ;;  %v116_v4 = vadd.f32 %v111_v62, %v101_v45 }
  0x46   :  { %v114_v5 = vmul.f32 %v109_v0, %v44_v59  ;;  %v117_v6 = vadd.f32 %v112_v1, %v102_v50 }
  0x47   :  { %v115_v7 = vmul.f32 %v110_v2, %v45_v63  ;;  %v118_v8 = vadd.f32 %v113_v3, %v103_v54  ;;  %v121_v9 = vsub.f32 0.0, %v116_v4 }
  0x48   :  { %v119_v10 = vadd.f32 %v114_v5, %v104_v57  ;;  %v122_v11 = vsub.f32 0.0, %v117_v6 }
  0x49   :  { %v120_v12 = vadd.f32 %v115_v7, %v105_v60  ;;  %v123_v13 = vsub.f32 0.0, %v118_v8 }
  0x4a   :  { %v124_v14 = vsub.f32 0.0, %v119_v10  ;;  %v126_v15 = vadd.f32 %v122_v11, %v121_v9 }
  0x4b   :  { %v125_v16 = vsub.f32 0.0, %v120_v12 }
  0x4c   :  { %v127_v17 = vadd.f32 %v126_v15, %v123_v13 }
  0x4d   :  { %v130_v18 = vsel %vm129_vm11, %v125_v16, 0.0 }
  0x4e   :  { %v128_v19 = vadd.f32 %v127_v17, %v124_v14 }
  0x50   :  { %v131_v20 = vadd.f32 %v130_v18, %v128_v19 }
  0x52   :  { %132 = vadd.xlane.f32.xlu0 %v131_v20 }
  0xdf   :  { %v133_v21 = vpop.xlane.xlu0 %132 }
  0xe0   :  { %v134_v22 = vrot.slane %v133_v21, 4 }
  0xe2   :  { %v135_v23 = vadd.f32 %v134_v22, %v133_v21 }
  0xe4   :  { %v136_v24 = vrot.slane %v135_v23, 2 }
  0xe6   :  { %v137_v25 = vadd.f32 %v136_v24, %v135_v23 }
  0xe8   :  { %v138_v26 = vrot.slane %v137_v25, 1 }
  0xea   :  { %v139_v27 = vadd.f32 %v138_v26, %v137_v25 }
  0xec   :  { %161 = vpush %v139_v27 }
 0x11d   :  { %s162_s1 = spop %161 }
 0x11e   :  { %s143_s4 = smul.f32 0.00023719165, %s162_s1 }
 0x120   :  { %145 = sst [smem:[#allocation7]] %s143_s4 }
 0x121   :  { %240 = shalt.err (!%p237_p4)
}
 0x122   :  { %s250_s12 = smov [#allocation7]  }
 0x123   :  { %153 = dma.smem_to_hbm %s250_s12, 16, %s304_s2, [#allocation4]  }
 0x124   :  { %245 = dma.done.wait [#allocation4], 16  }
 0x125   :  { %246 = vsyncadd [#allocation4], 4294967280 }
 0x126   :  { %157 = sfence }
 0x127   :  { %158 = vsyncpa [#allocation3], 1 }
 0x128   :  { %159 = vsyncpa [#allocation6], 1 }
 0x129   :  { %160 = vsyncpa [#allocation4], 1 }

</bundles_post_ra>
